<compile_context>
chip_gen: v7x
topology: tpu7x:2x2x1
jax: 0.10.0
libtpu: 0.0.40
codegen_flags: <defaults>
</compile_context>

<pallas_src>
import jax
import jax.numpy as jnp
from jax.experimental import pallas as pl
from jax.experimental.pallas import tpu as pltpu

_LANE = 128
_MIN_PIPELINE_BYTES = 256 * 1024   # below this a single block is fine
_MIN_GRID_STEPS = 4                # target pipeline depth for larger inputs
_MiB = 1024 * 1024


def _swish_kernel(x_ref, o_ref):
    x = x_ref[...]
    h = 0.5 * x.astype(jnp.float32)
    # x * sigmoid(x) == h + h * tanh(h), h = x/2  (single EUP transcendental).
    o_ref[...] = (h + h * jnp.tanh(h)).astype(o_ref.dtype)


def _swish_xla(x):
    """Plain-XLA swish for tiny / ragged tails (already at the 1R+1W roofline)."""
    xf = x.astype(jnp.float32)
    return (xf * jax.nn.sigmoid(xf)).astype(x.dtype)


def _default_tile_bytes():
    """Per-generation tile size: ~6 MiB on 128 MiB-VMEM chips, ~4 MiB on v7x."""
    try:
        info = pltpu.get_tpu_info()
        vmem = getattr(info, "vmem_capacity_bytes", 64 * _MiB)
    except Exception:  # non-TPU tracing / older API: be conservative
        vmem = 64 * _MiB
    return int(min(6 * _MiB, max(2 * _MiB, vmem // 16)))


def swish(x, *, tile_bytes=None):
    """Elementwise Swish (x * sigmoid(x)) for floating-point inputs of any shape."""
    orig_shape = x.shape
    orig_dtype = x.dtype
    n = x.size
    if n == 0:
        return x
    itemsize = jnp.dtype(orig_dtype).itemsize
    if tile_bytes is None:
        tile_bytes = _default_tile_bytes()

    xf = jnp.ravel(x)
    rem = n % _LANE
    n_aligned = n - rem

    if n_aligned == 0:
        # Fewer than 128 elements: grid-step overhead dwarfs the work.
        return _swish_xla(xf).reshape(orig_shape)

    rows = n_aligned // _LANE
    x2d = (xf[:n_aligned] if rem else xf).reshape(rows, _LANE)

    # Packed-sublane multiple for this dtype (8 f32, 16 bf16, 32 int8/fp8).
    sub = max(8, (32 // itemsize) * 8)

    # Row-tile sized for ~tile_bytes of data per grid step.
    desired_rows = max(sub, tile_bytes // (_LANE * itemsize))
    desired_rows -= desired_rows % sub

    # For non-trivial inputs force >= _MIN_GRID_STEPS grid steps so the DMA
    # pipeline overlaps and v7x can shard the parallel axis over both TCs.
    data_bytes = rows * _LANE * itemsize
    if data_bytes >= _MIN_PIPELINE_BYTES:
        cap = pl.cdiv(rows, _MIN_GRID_STEPS)
        cap = ((cap + sub - 1) // sub) * sub
        desired_rows = max(sub, min(desired_rows, cap))

    if rows <= desired_rows:
        tile_rows = rows            # single block == full array extent (legal)
    else:
        tile_rows = desired_rows    # sublane-multiple; ragged tail block is fine

    grid = (pl.cdiv(rows, tile_rows),)

    # 1 in + 1 out, double-buffered => ~4 * block bytes live, plus headroom.
    block_bytes = tile_rows * _LANE * itemsize
    vmem_limit = int(max(16 * _MiB, 4 * block_bytes + 2 * _MiB))

    cost = pl.CostEstimate(
        flops=3 * n_aligned,
        transcendentals=n_aligned,
        bytes_accessed=2 * n_aligned * itemsize,
    )

    out2d = pl.pallas_call(
        _swish_kernel,
        out_shape=jax.ShapeDtypeStruct((rows, _LANE), orig_dtype),
        grid_spec=pltpu.PrefetchScalarGridSpec(
            num_scalar_prefetch=0,
            grid=grid,
            in_specs=[pl.BlockSpec((tile_rows, _LANE), lambda i: (i, 0))],
            out_specs=pl.BlockSpec((tile_rows, _LANE), lambda i: (i, 0)),
        ),
        compiler_params=pltpu.CompilerParams(
            dimension_semantics=("parallel",),
            vmem_limit_bytes=vmem_limit,
        ),
        cost_estimate=cost,
    )(x2d)

    if rem:
        # <128-element tail: compute with XLA and splice behind the kernel output.
        tail = _swish_xla(xf[n_aligned:])
        return jnp.concatenate([out2d.reshape(-1), tail]).reshape(orig_shape)
    return out2d.reshape(orig_shape)


def swish_ref(x):
    xf = x.astype(jnp.float32)
    return (xf * jax.nn.sigmoid(xf)).astype(x.dtype)


if __name__ == "__main__":
    key = jax.random.PRNGKey(0)
    k0, k1, k2, k3 = jax.random.split(key, 4)

    # Small NCHW input consistent with typical usage of Swish in the net.
    x = jax.random.normal(k0, (2, 4, 16, 16), dtype=jnp.float32)
    y = swish(x)
    jax.block_until_ready(y)
    assert y.shape == x.shape and y.dtype == x.dtype
    assert jnp.allclose(y, swish_ref(x), atol=1e-5, rtol=1e-5)

    # Multi-block path (small tile_bytes forces several grid steps).
    x2 = jax.random.normal(k1, (2, 8, 72, 128), dtype=jnp.float32)
    y2 = swish(x2, tile_bytes=64 * 1024)
    jax.block_until_ready(y2)
    assert jnp.allclose(y2, swish_ref(x2), atol=1e-5, rtol=1e-5)

    # Non-128-multiple flat size -> aligned-prefix kernel + XLA tail path.
    x3 = jax.random.normal(k2, (3, 5, 7, 11), dtype=jnp.float32)
    y3 = swish(x3)
    jax.block_until_ready(y3)
    assert jnp.allclose(y3, swish_ref(x3), atol=1e-5, rtol=1e-5)

    # bf16 input: exercises packed-sublane tile rounding + min-grid-depth cap.
    x4 = jax.random.normal(k3, (2, 16, 64, 128), dtype=jnp.bfloat16)
    y4 = swish(x4)
    jax.block_until_ready(y4)
    assert y4.dtype == jnp.bfloat16
    assert jnp.allclose(y4.astype(jnp.float32), swish_ref(x4).astype(jnp.float32),
                        atol=2e-2, rtol=2e-2)

    print("KERNEL_OK")
</pallas_src>

<mosaic_0001>
module attributes {stable_mosaic.version = 11 : i64} {
  func.func @_swish_kernel(%arg0: i32, %arg1: memref<16x128xf32, #tpu.memory_space<vmem>>, %arg2: memref<16x128xf32, #tpu.memory_space<vmem>>) attributes {dimension_semantics = [#tpu.dimension_semantics<parallel>], iteration_bounds = array<i64: 1>, scalar_prefetch = 0 : i64, scratch_operands = 0 : i64, tpu.core_type = #tpu.core_type<tc>, window_params = [{transform_indices = @transform_0, window_bounds = array<i64: 16, 128>}, {transform_indices = @transform_1, window_bounds = array<i64: 16, 128>}]} {
    %c0 = arith.constant 0 : index
    %c0_0 = arith.constant 0 : index
    %0 = vector.load %arg1[%c0, %c0_0] : memref<16x128xf32, #tpu.memory_space<vmem>>, vector<16x128xf32>
    %cst = arith.constant 5.000000e-01 : f32
    %1 = vector.broadcast %cst : f32 to vector<16x128xf32>
    %2 = arith.mulf %1, %0 : vector<16x128xf32>
    %3 = math.tanh %2 : vector<16x128xf32>
    %4 = arith.mulf %2, %3 : vector<16x128xf32>
    %5 = arith.addf %2, %4 : vector<16x128xf32>
    %c0_1 = arith.constant 0 : index
    %c0_2 = arith.constant 0 : index
    %6 = vector.load %arg2[%c0_1, %c0_2] : memref<16x128xf32, #tpu.memory_space<vmem>>, vector<16x128xf32>
    tpu.vector_store %arg2[%c0_1, %c0_2], %5 {strides = array<i32>} : memref<16x128xf32, #tpu.memory_space<vmem>>, vector<16x128xf32>,
    return
  }
  func.func @transform_0(%arg0: i32) -> (i32, i32) {
    %c0_i32 = arith.constant 0 : i32
    %c0_i32_0 = arith.constant 0 : i32
    return %arg0, %c0_i32 : i32, i32
  }
  func.func @transform_1(%arg0: i32) -> (i32, i32) {
    %c0_i32 = arith.constant 0 : i32
    %c0_i32_0 = arith.constant 0 : i32
    return %arg0, %c0_i32 : i32, i32
  }
}

</mosaic_0001>

<bundles_post_ra>
// kernel: tpu_custom_call.1
= control target key start
LH: loop header
LB: loop body
LE: loop exit
PB: predicated region body
PF: predicated region fallthrough
CT: control target
= control target key end

     0   :  { %6 = vsyncpa [#allocation3], 0  ;;  %s152_s0 = inlined_call_operand.hbm [shape: f32[16,128], index: 0, kind: input, shape index: {}]   ;;  %s153_s1 = inlined_call_operand.hbm [shape: f32[16,128], index: 1, kind: output, shape index: {}]  }
   0x1   :  { %7 = vsyncpa [#allocation4], 0  ;;  %s108_s6 = smov [#allocation2]   ;;  %s60_s10 = scalar_lea.hbm %s152_s0, 256 }
   0x2   :  { %s13_s7 = sshll.u32 %s108_s6, 4  ;;  %p61_p0 = scmp.ne.s32.totalorder %s152_s0, %s60_s10  ;;  %s14_s7 = int_to_ptr.vmem [resolvable:$true] %s13_s7 }
   0x3   :  { %p64_p1 = scmp.lt.u32.totalorder %s60_s10, %s152_s0 }
   0x5   :  { %p66_p2 = pnand %p64_p1, %p61_p0 }
   0x7   :  { %69 = shalt.err (!%p66_p2)
}
   0x8   :  { %s70_s15 = scalar_lea.vmem %s14_s7, 256  ;;  %p75_p4 = scmp.lt.s32.totalorder %s14_s7, %s14_s7 }
   0x9   :  { %p71_p3 = scmp.ne.s32.totalorder %s14_s7, %s70_s15  ;;  %p76_p5 = scmp.lt.s32.totalorder %s70_s15, %s70_s15 }
   0xb   :  { %p77_p6 = por %p76_p5, %p75_p4 }
   0xd   :  { %p78_p7 = pnand %p77_p6, %p71_p3 }
   0xf   :  { %81 = shalt.err (!%p78_p7)
}
  0x10   :  { %s109_s16 = smov 128   ;;  %s110_s17 = smov 8  }
  0x11   :  { %19 = dma.hbm_to_vmem [thread:$0]  %s152_s0, 256, %s14_s7, [#allocation3], %s109_s16, %s109_s16, %s110_s17  }
  0x12   :  { %104 = dma.done.wait [#allocation3], 256  }
  0x13   :  { %105 = vsyncadd [#allocation3], 4294967040  ;;  %v23_v0 = vld [vmem:[#allocation2] sm:$0xff]  ;;  %v24_v1 = vld [vmem:[#allocation2 + $0x8] sm:$0xff]  ;;  %s111_s20 = smov [#allocation5]  }
  0x14   :  { %v25_v2 = vmul.f32 0.5, %v23_v0  ;;  %v26_v3 = vmul.f32 0.5, %v24_v1  ;;  %s40_s21 = sshll.u32 %s111_s20, 4  ;;  %s41_s21 = int_to_ptr.vmem [resolvable:$true] %s40_s21 }
  0x15   :  { %s82_s0 = scalar_lea.vmem %s41_s21, 256  ;;  %p87_p9 = scmp.lt.s32.totalorder %s41_s21, %s41_s21 }
  0x16   :  { %56 = vtanh.f32 %v25_v2  ;;  %p83_p8 = scmp.ne.s32.totalorder %s41_s21, %s82_s0  ;;  %p88_p10 = scmp.lt.s32.totalorder %s82_s0, %s82_s0 }
  0x17   :  { %58 = vtanh.f32 %v26_v3 }
  0x18   :  { %p89_p11 = por %p88_p10, %p87_p9 }
  0x1a   :  { %p90_p12 = pnand %p89_p11, %p83_p8 }
  0x20   :  { %v57_v4 = vpop.eup %56 }
  0x21   :  { %v59_v5 = vpop.eup %58  ;;  %v29_v6 = vmul.f32 %v57_v4, %v25_v2 }
  0x22   :  { %v30_v7 = vmul.f32 %v59_v5, %v26_v3 }
  0x23   :  { %v31_v8 = vadd.f32 %v29_v6, %v25_v2 }
  0x24   :  { %v32_v9 = vadd.f32 %v30_v7, %v26_v3 }
  0x25   :  { %33 = vst [vmem:[#allocation5] sm:$0xff] %v31_v8 }
  0x26   :  { %34 = vst [vmem:[#allocation5 + $0x8] sm:$0xff] %v32_v9 }
  0x27   :  { %93 = shalt.err (!%p90_p12)
}
  0x28   :  { %s94_s24 = scalar_lea.hbm %s153_s1, 256 }
  0x29   :  { %p95_p13 = scmp.ne.s32.totalorder %s153_s1, %s94_s24  ;;  %p98_p0 = scmp.lt.u32.totalorder %s94_s24, %s153_s1 }
  0x2b   :  { %p100_p1 = pnand %p98_p0, %p95_p13 }
  0x2d   :  { %103 = shalt.err (!%p100_p1)
}
  0x2e   :  { %46 = dma.vmem_to_hbm [thread:$0]  %s41_s21, 256, %s153_s1, [#allocation4], %s109_s16, %s109_s16, %s110_s17  }
  0x2f   :  { %106 = dma.done.wait [#allocation4], 256  }
  0x30   :  { %107 = vsyncadd [#allocation4], 4294967040 }
  0x31   :  { %50 = vsyncpa [#allocation3], 1 }
  0x32   :  { %51 = vsyncpa [#allocation4], 1 }

</bundles_post_ra>
